<compile_context>
chip_gen: v6e
topology: v6e:2x2x1
jax: 0.10.0
libtpu: 0.0.40
codegen_flags: <defaults>
</compile_context>

<pallas_src>
import math

import jax
import jax.numpy as jnp
from jax.experimental import pallas as pl
from jax.experimental.pallas import tpu as pltpu


_ROW_ALIGN = 8                              # sublane granularity for output blocks
_LANE = 128                                 # lane granularity for output last dim
_VMEM_LIMIT_BYTES = 48 * 1024 * 1024        # <= v7x 64 MiB/TC physical; fine on v5e/v6e
_PIPELINE_SLACK_BYTES = 8 * 1024 * 1024     # headroom for Mosaic internal scratch


def _round_up(x, m):
    return ((x + m - 1) // m) * m


def _prior_kernel(var_min, var_max, trainable_var, row_block, packed_dim):
    """Kernel closure over static hyper-params and block geometry."""
    scale = var_max - var_min

    def kernel(mean_ref, var_ref, mean_out_ref, logvar_out_ref):
        # mean_ref / var_ref: (1, packed_dim) VMEM tiles.  Their block index is
        # constant across the grid, so Pallas keeps them resident (no re-fetch).
        mean_row = mean_ref[...]
        v = var_ref[...]
        if trainable_var:
            # Clamped sigmoid: exp() stays finite, value is forward-exact
            # (sigmoid is fully saturated well before |x| = 30).
            sig = 1.0 / (1.0 + jnp.exp(-jnp.clip(v, -30.0, 30.0)))
            var = var_min + scale * sig
        else:
            var = v  # fixed-variance path: v already holds the variance
        logvar_row = jnp.log(var)

        # Broadcast one packed parameter row over the whole lane-dense block.
        # This is the only per-step work besides the stores and is fully
        # hidden under the output DMA.
        mean_out_ref[...] = jnp.broadcast_to(mean_row, (row_block, packed_dim))
        logvar_out_ref[...] = jnp.broadcast_to(logvar_row, (row_block, packed_dim))

    return kernel


def learnable_gaussian_prior_forward(
    mean,
    var_param,
    batch_size,
    time_steps,
    var_min=1e-6,
    var_max=1000.0,
    trainable_var=True,
):
    """Pallas forward.

    mean: (D,) float32.
    var_param: (D,) float32 — var_logit if trainable_var else fixed_var.
    Returns (mean_out, logvar_out), each (B, T, D) float32.
    """
    latent_dim = mean.shape[0]
    total_rows = batch_size * time_steps

    # --- Lane-dense packing: fold k consecutive rows of the flat (B*T, D) view
    # into one kernel row so the output last dim is a multiple of 128.
    k = _LANE // math.gcd(latent_dim, _LANE)
    packed_dim = k * latent_dim
    packed_rows = -(-total_rows // k)  # ceil: pad rows, slice after the call

    # Parameters tiled to one packed row (layout plumbing only, O(k*D)).
    mean_p = jnp.tile(mean.astype(jnp.float32), (k,)).reshape(1, packed_dim)
    var_p = jnp.tile(var_param.astype(jnp.float32), (k,)).reshape(1, packed_dim)

    # --- Row blocking, derived from the VMEM limit:
    #   block_bytes <= (vmem_limit - inputs - slack) / (2 outputs x 2 buffers)
    bytes_per_row = packed_dim * 4
    input_bytes = 2 * 2 * bytes_per_row  # 2 inputs x 2 pipeline buffers
    block_budget = max(
        bytes_per_row * _ROW_ALIGN,
        (_VMEM_LIMIT_BYTES - _PIPELINE_SLACK_BYTES - input_bytes) // 4,
    )
    rows_budget = max(
        _ROW_ALIGN, (block_budget // bytes_per_row) // _ROW_ALIGN * _ROW_ALIGN
    )

    # Guarantee >= 2 grid steps whenever there is enough work, so the
    # "parallel" grid axis shards across v7x's two TensorCores.
    if packed_rows >= 2 * _ROW_ALIGN:
        half = max(_ROW_ALIGN, ((packed_rows + 1) // 2) // _ROW_ALIGN * _ROW_ALIGN)
        rows_budget = min(rows_budget, half)

    # Balanced blocks + row padding (no single-full-extent fallback): at most
    # row_block-1 rows of padding total, every store stays unmasked.
    num_blocks = max(1, -(-packed_rows // rows_budget))
    row_block = _round_up(max(1, -(-packed_rows // num_blocks)), _ROW_ALIGN)
    padded_rows = num_blocks * row_block
    grid = (num_blocks,)

    kernel = _prior_kernel(
        float(var_min), float(var_max), bool(trainable_var), row_block, packed_dim
    )

    out_shape = (
        jax.ShapeDtypeStruct((padded_rows, packed_dim), jnp.float32),
        jax.ShapeDtypeStruct((padded_rows, packed_dim), jnp.float32),
    )

    mean_out, logvar_out = pl.pallas_call(
        kernel,
        out_shape=out_shape,
        grid_spec=pltpu.PrefetchScalarGridSpec(
            num_scalar_prefetch=0,
            grid=grid,
            in_specs=[
                pl.BlockSpec((1, packed_dim), lambda r: (0, 0)),
                pl.BlockSpec((1, packed_dim), lambda r: (0, 0)),
            ],
            out_specs=[
                pl.BlockSpec((row_block, packed_dim), lambda r: (r, 0)),
                pl.BlockSpec((row_block, packed_dim), lambda r: (r, 0)),
            ],
        ),
        compiler_params=pltpu.CompilerParams(
            dimension_semantics=("parallel",),
            vmem_limit_bytes=_VMEM_LIMIT_BYTES,
        ),
    )(mean_p, var_p)

    # Exact inverse of the packing: unfold lanes back to rows, drop the padded
    # tail, reshape to the PyTorch output layout.
    mean_out = mean_out.reshape(padded_rows * k, latent_dim)[:total_rows]
    logvar_out = logvar_out.reshape(padded_rows * k, latent_dim)[:total_rows]
    mean_out = mean_out.reshape(batch_size, time_steps, latent_dim)
    logvar_out = logvar_out.reshape(batch_size, time_steps, latent_dim)
    return mean_out, logvar_out


if __name__ == "__main__":
    # Small shapes consistent with the module's forward(batch_size, time_steps).
    batch_size = 2
    time_steps = 8
    latent_dim = 32

    key = jax.random.PRNGKey(0)
    k_mean, k_vl = jax.random.split(key)

    # ---------- Trainable-variance path (var_min < var_max) ----------
    var_min, var_max = 1e-6, 1000.0
    mean_init, var_init = 0.0, 1.0

    mean_param = mean_init + 0.1 * jax.random.normal(k_mean, (latent_dim,), jnp.float32)
    var_normalized = (var_init - var_min) / (var_max - var_min)
    var_logit_init = jnp.log(var_normalized / (1.0 - var_normalized + 1e-12))
    var_logit_param = (
        var_logit_init * jnp.ones((latent_dim,), jnp.float32)
        + 0.1 * jax.random.normal(k_vl, (latent_dim,), jnp.float32)
    )

    mean_out, logvar_out = learnable_gaussian_prior_forward(
        mean_param, var_logit_param, batch_size, time_steps,
        var_min, var_max, trainable_var=True,
    )
    jax.block_until_ready((mean_out, logvar_out))

    ref_mean = jnp.broadcast_to(
        mean_param[None, None, :], (batch_size, time_steps, latent_dim)
    )
    ref_var = var_min + (var_max - var_min) * jax.nn.sigmoid(var_logit_param)
    ref_logvar = jnp.broadcast_to(
        jnp.log(ref_var)[None, None, :], (batch_size, time_steps, latent_dim)
    )
    assert mean_out.shape == (batch_size, time_steps, latent_dim)
    assert jnp.allclose(mean_out, ref_mean, atol=1e-6, rtol=1e-6)
    assert jnp.allclose(logvar_out, ref_logvar, atol=1e-5, rtol=1e-5)

    # ---------- Fixed-variance path (var_min >= var_max) ----------
    fixed_var = 1.5 * jnp.ones((latent_dim,), jnp.float32)
    mean_out_f, logvar_out_f = learnable_gaussian_prior_forward(
        mean_param, fixed_var, batch_size, time_steps,
        var_min=2.0, var_max=1.0, trainable_var=False,
    )
    jax.block_until_ready((mean_out_f, logvar_out_f))

    ref_logvar_f = jnp.broadcast_to(
        jnp.log(fixed_var)[None, None, :], (batch_size, time_steps, latent_dim)
    )
    assert jnp.allclose(mean_out_f, ref_mean, atol=1e-6, rtol=1e-6)
    assert jnp.allclose(logvar_out_f, ref_logvar_f, atol=1e-6, rtol=1e-6)

    print("KERNEL_OK")
</pallas_src>

<mosaic_0001>
module attributes {stable_mosaic.version = 11 : i64} {
  func.func @kernel(%arg0: i32, %arg1: memref<1x128xf32, #tpu.memory_space<vmem>>, %arg2: memref<1x128xf32, #tpu.memory_space<vmem>>, %arg3: memref<8x128xf32, #tpu.memory_space<vmem>>, %arg4: memref<8x128xf32, #tpu.memory_space<vmem>>) attributes {dimension_semantics = [#tpu.dimension_semantics<parallel>], iteration_bounds = array<i64: 1>, scalar_prefetch = 0 : i64, scratch_operands = 0 : i64, tpu.core_type = #tpu.core_type<tc>, window_params = [{pipeline_mode = #tpu.pipeline_mode<synchronous>, transform_indices = @transform_0, window_bounds = array<i64: 1, 128>}, {pipeline_mode = #tpu.pipeline_mode<synchronous>, transform_indices = @transform_1, window_bounds = array<i64: 1, 128>}, {transform_indices = @transform_2, window_bounds = array<i64: 8, 128>}, {transform_indices = @transform_3, window_bounds = array<i64: 8, 128>}]} {
    %c0 = arith.constant 0 : index
    %c0_0 = arith.constant 0 : index
    %0 = vector.load %arg1[%c0, %c0_0] : memref<1x128xf32, #tpu.memory_space<vmem>>, vector<1x128xf32>
    %c0_1 = arith.constant 0 : index
    %c0_2 = arith.constant 0 : index
    %1 = vector.load %arg2[%c0_1, %c0_2] : memref<1x128xf32, #tpu.memory_space<vmem>>, vector<1x128xf32>
    %cst = arith.constant -3.000000e+01 : f32
    %cst_3 = arith.constant 3.000000e+01 : f32
    %2 = vector.broadcast %cst : f32 to vector<1x128xf32>
    %3 = arith.maximumf %2, %1 : vector<1x128xf32>
    %4 = vector.broadcast %cst_3 : f32 to vector<1x128xf32>
    %5 = arith.minimumf %4, %3 : vector<1x128xf32>
    %cst_4 = arith.constant 0.000000e+00 : f32
    %6 = vector.broadcast %cst_4 : f32 to vector<1x128xf32>
    %7 = arith.subf %6, %5 : vector<1x128xf32>
    %8 = math.exp %7 : vector<1x128xf32>
    %cst_5 = arith.constant 1.000000e+00 : f32
    %9 = vector.broadcast %cst_5 : f32 to vector<1x128xf32>
    %10 = arith.addf %9, %8 : vector<1x128xf32>
    %cst_6 = arith.constant 1.000000e+00 : f32
    %11 = vector.broadcast %cst_6 : f32 to vector<1x128xf32>
    %12 = arith.divf %11, %10 : vector<1x128xf32>
    %cst_7 = arith.constant 1.000000e+03 : f32
    %13 = vector.broadcast %cst_7 : f32 to vector<1x128xf32>
    %14 = arith.mulf %13, %12 : vector<1x128xf32>
    %cst_8 = arith.constant 9.99999997E-7 : f32
    %15 = vector.broadcast %cst_8 : f32 to vector<1x128xf32>
    %16 = arith.addf %15, %14 : vector<1x128xf32>
    %17 = math.log %16 : vector<1x128xf32>
    %18 = vector.shape_cast %0 : vector<1x128xf32> to vector<1x128xf32>
    %19 = vector.broadcast %18 : vector<1x128xf32> to vector<8x128xf32>
    %c0_9 = arith.constant 0 : index
    %c0_10 = arith.constant 0 : index
    %20 = vector.load %arg3[%c0_9, %c0_10] : memref<8x128xf32, #tpu.memory_space<vmem>>, vector<8x128xf32>
    tpu.vector_store %arg3[%c0_9, %c0_10], %19 {strides = array<i32>} : memref<8x128xf32, #tpu.memory_space<vmem>>, vector<8x128xf32>,
    %21 = vector.shape_cast %17 : vector<1x128xf32> to vector<1x128xf32>
    %22 = vector.broadcast %21 : vector<1x128xf32> to vector<8x128xf32>
    %c0_11 = arith.constant 0 : index
    %c0_12 = arith.constant 0 : index
    %23 = vector.load %arg4[%c0_11, %c0_12] : memref<8x128xf32, #tpu.memory_space<vmem>>, vector<8x128xf32>
    tpu.vector_store %arg4[%c0_11, %c0_12], %22 {strides = array<i32>} : memref<8x128xf32, #tpu.memory_space<vmem>>, vector<8x128xf32>,
    return
  }
  func.func @transform_0(%arg0: i32) -> (i32, i32) {
    %c0_i32 = arith.constant 0 : i32
    %c0_i32_0 = arith.constant 0 : i32
    %c0_i32_1 = arith.constant 0 : i32
    return %c0_i32, %c0_i32_0 : i32, i32
  }
  func.func @transform_1(%arg0: i32) -> (i32, i32) {
    %c0_i32 = arith.constant 0 : i32
    %c0_i32_0 = arith.constant 0 : i32
    %c0_i32_1 = arith.constant 0 : i32
    return %c0_i32, %c0_i32_0 : i32, i32
  }
  func.func @transform_2(%arg0: i32) -> (i32, i32) {
    %c0_i32 = arith.constant 0 : i32
    %c0_i32_0 = arith.constant 0 : i32
    return %arg0, %c0_i32 : i32, i32
  }
  func.func @transform_3(%arg0: i32) -> (i32, i32) {
    %c0_i32 = arith.constant 0 : i32
    %c0_i32_0 = arith.constant 0 : i32
    return %arg0, %c0_i32 : i32, i32
  }
}

</mosaic_0001>

<bundles_post_ra>
// kernel: tpu_custom_call.1
= control target key start
LH: loop header
LB: loop body
LE: loop exit
PB: predicated region body
PF: predicated region fallthrough
CT: control target
= control target key end

     0   :  { %9 = vsyncpa [#allocation3], 0  ;;  %s196_s0 = inlined_call_operand.hbm [shape: f32[1,128], index: 0, kind: input, shape index: {}]   ;;  %s197_s1 = inlined_call_operand.vmem [shape: f32[1,128], index: 1, kind: input, shape index: {}]   ;;  %s198_s2 = inlined_call_operand.hbm [shape: f32[8,128], index: 2, kind: output, shape index: {0}]   ;;  %s199_s3 = inlined_call_operand.hbm [shape: f32[8,128], index: 3, kind: output, shape index: {1}]  }
   0x1   :  { %10 = vsyncpa [#allocation4], 0 }
   0x2   :  { %11 = vsyncpa [#allocation7], 0  ;;  %s161_s12 = smov [#allocation2]  }
   0x3   :  { %s18_s13 = sshll.u32 %s161_s12, 4  ;;  %s19_s13 = int_to_ptr.vmem [resolvable:$true] %s18_s13 }
   0x4   :  { %s103_s14 = scalar_lea.vmem %s19_s13, 16  ;;  %s107_s15 = scalar_lea.vmem %s19_s13, 32 }
   0x5   :  { %p104_p0 = scmp.ne.s32.totalorder %s19_s13, %s103_s14  ;;  %p108_p1 = scmp.lt.s32.totalorder %s19_s13, %s19_s13 }
   0x6   :  { %p109_p2 = scmp.lt.s32.totalorder %s107_s15, %s103_s14 }
   0x8   :  { %p110_p3 = por %p109_p2, %p108_p1 }
   0xa   :  { %p111_p4 = pnand %p110_p3, %p104_p0 }
   0xc   :  { %114 = shalt.err (!%p111_p4)
}
   0xd   :  { %21 = dma.hbm_to_vmem [thread:$0]  %s196_s0, 16, %s19_s13, [#allocation3]  }
   0xe   :  { %155 = dma.done.wait [#allocation3], 16  }
   0xf   :  { %156 = vsyncadd [#allocation3], 4294967280  ;;  %s162_s18 = smov [#allocation5]   ;;  %v85_v0 = vld [vmem:[#allocation2] ss:$0 sm:$0xff] }
  0x10   :  { %s61_s19 = sshll.u32 %s162_s18, 4  ;;  %v28_v1 = vld [vmem:[%s197_s1] sm:$0x1]  ;;  %47 = vst [vmem:[#allocation5] sm:$0xff] %v85_v0  ;;  %s62_s19 = int_to_ptr.vmem [resolvable:$true] %s61_s19 }
  0x11   :  { %v84_v2 = vclamps-f32 %v28_v1, 30.0  ;;  %s115_s22 = scalar_lea.vmem %s62_s19, 128  ;;  %p120_p6 = scmp.lt.s32.totalorder %s62_s19, %s62_s19 }
  0x12   :  { %p116_p5 = scmp.ne.s32.totalorder %s62_s19, %s115_s22  ;;  %p121_p7 = scmp.lt.s32.totalorder %s115_s22, %s115_s22 }
  0x14   :  { %p122_p8 = por %p121_p7, %p120_p6 }
  0x16   :  { %p123_p9 = pnand %p122_p8, %p116_p5 }
  0x18   :  { %126 = shalt.err (!%p123_p9)
}
  0x19   :  { %64 = dma.vmem_to_hbm [thread:$0]  %s62_s19, 128, %s198_s2, [#allocation4]   ;;  %v31_v3 = vsub.f32 0.0, %v84_v2  ;;  %v49_v10 = vlaneseq }
  0x1a   :  { %s163_s1 = smov [#allocation6]  }
  0x1b   :  { %v32_v4 = vmul.f32 1.442695, %v31_v3  ;;  %v50_v11 = vshrl.u32 %v49_v10, 7  ;;  %s71_s24 = sshll.u32 %s163_s1, 4  ;;  %s72_s24 = int_to_ptr.vmem [resolvable:$true] %s71_s24 }
  0x1c   :  { %s135_s2 = scalar_lea.vmem %s72_s24, 128  ;;  %p140_p11 = scmp.lt.s32.totalorder %s72_s24, %s72_s24 }
  0x1d   :  { %89 = vpow2.f32 %v32_v4  ;;  %v51_v12 = vsub.s32 0, %v50_v11  ;;  %p136_p10 = scmp.ne.s32.totalorder %s72_s24, %s135_s2  ;;  %p141_p12 = scmp.lt.s32.totalorder %s135_s2, %s135_s2 }
  0x1f   :  { %p142_p13 = por %p141_p12, %p140_p11 }
  0x21   :  { %p143_p0 = pnand %p142_p13, %p136_p10 }
  0x2a   :  { %v90_v5 = vpop.eup %89 }
  0x2b   :  { %v34_v6 = vadd.f32 1.0, %v90_v5 }
  0x2d   :  { %91 = vrcp.f32 %v34_v6 }
  0x3a   :  { %v92_v7 = vpop.eup %91 }
  0x3b   :  { %v37_v8 = vmul.f32 1000.0, %v92_v7 }
  0x3d   :  { %v38_v9 = vadd.f32 1e-06, %v37_v8 }
  0x3f   :  { %93 = vlog2.f32 %v38_v9 }
  0x4c   :  { %v94_v13 = vpop.eup %93 }
  0x4d   :  { %v40_v14 = vmul.f32 0.6931472, %v94_v13 }
  0x4f   :  { %v52_v15 = vrot.slane %v40_v14, %v51_v12 }
  0x51   :  { %54 = vst [vmem:[#allocation6] sm:$0xff] %v52_v15 }
  0x52   :  { %146 = shalt.err (!%p143_p0)
}
  0x53   :  { %74 = dma.vmem_to_hbm [thread:$0]  %s72_s24, 128, %s199_s3, [#allocation7]  }
  0x54   :  { %157 = dma.done.wait [#allocation4], 128  }
  0x55   :  { %158 = vsyncadd [#allocation4], 4294967168 }
  0x56   :  { %159 = dma.done.wait [#allocation7], 128  }
  0x57   :  { %160 = vsyncadd [#allocation7], 4294967168 }
  0x58   :  { %81 = vsyncpa [#allocation3], 1 }
  0x59   :  { %82 = vsyncpa [#allocation4], 1 }
  0x5a   :  { %83 = vsyncpa [#allocation7], 1 }

</bundles_post_ra>
